<compile_context>
chip_gen: v5e
topology: v5e:2x2
jax: 0.10.0
libtpu: 0.0.40
codegen_flags: <defaults>
</compile_context>

<pallas_src>
import functools
import math

import jax
import jax.numpy as jnp
from jax.experimental import pallas as pl
from jax.experimental.pallas import tpu as pltpu

BN_EPS = 1e-5
LANE = 128
_MAX_UNROLL = 8                 # max middle layers fused into one grid step
_CHUNK_WEIGHT_BYTES = 4 << 20   # per-buffer cap for a streamed weight chunk

# CompilerParams was called TPUCompilerParams in older jax releases.
_CompilerParams = getattr(pltpu, "CompilerParams", None) or getattr(
    pltpu, "TPUCompilerParams")


def _round_up(n, m):
    return ((n + m - 1) // m) * m


def _vmem_capacity_bytes():
    """Chip VMEM capacity; conservative 64 MiB (v7x) fallback."""
    try:
        info = pltpu.get_tpu_info()
        for name in ("vmem_capacity_bytes", "vmem_size_bytes", "vmem_bytes"):
            val = getattr(info, name, None)
            if val:
                return int(val)
    except Exception:
        pass
    return 64 << 20


def _apply_act(y, act, *, in_kernel):
    """Activation in f32.  In-kernel variants keep transcendentals on the EUP
    and move divisions onto the approx reciprocal path."""
    if act == "relu":
        return jnp.maximum(y, 0.0)
    if act == "sigmoid":
        z = 1.0 + jnp.exp(-y)            # exp overflow -> inf -> 1/inf=0: safe
        return pl.reciprocal(z, approx=True) if in_kernel else 1.0 / z
    if act == "mish":
        if in_kernel:
            # tanh(softplus(y)) == ((1+e^y)^2 - 1) / ((1+e^y)^2 + 1);
            # clamp e^y so the square cannot overflow (mish(y) -> y there).
            t = jnp.exp(jnp.minimum(y, 20.0))
            q = (1.0 + t) * (1.0 + t)
            return y * ((q - 1.0) * pl.reciprocal(q + 1.0, approx=True))
        sp = jnp.maximum(y, 0.0) + jnp.log1p(jnp.exp(-jnp.abs(y)))
        return y * jnp.tanh(sp)
    if act == "prelu":
        # nn.PReLU default single parameter, init value 0.25.
        return jnp.where(y >= 0.0, y, 0.25 * y)
    if act is None:
        return y
    raise AssertionError(f"unknown act {act!r}")


def _unit_compute(x_bf16, w_bf16, vec, flg_bn, act, *, in_kernel=True):
    """One Unit: Linear (MXU bf16 x bf16 -> f32) -> BatchNorm1d (train) -> act.

    x_bf16: (B, K) bf16, w_bf16: (K, N) bf16.
    vec = (gamma, beta), each (1, N) f32, when flg_bn; else (bias,) (1, N) f32.
    The Linear bias is omitted when flg_bn: it cancels exactly in y - mean(y).
    """
    y = jnp.dot(x_bf16, w_bf16, preferred_element_type=jnp.float32)
    if flg_bn:
        gamma, beta = vec
        mean = jnp.mean(y, axis=0, keepdims=True)
        d = y - mean
        var = jnp.mean(d * d, axis=0, keepdims=True)     # biased (train mode)
        y = d * (gamma * jax.lax.rsqrt(var + BN_EPS)) + beta   # fused scale/shift
    else:
        (bias,) = vec
        y = y + bias
    return _apply_act(y, act, in_kernel=in_kernel)


def _make_net_kernel(flg_bn, act, n_mid, n_chunks, lc):
    """Fused whole-network kernel; grid axis = layer-chunk index (sequential)."""

    def kernel(*refs):
        if n_mid > 0:
            (x_ref, wf_ref, vf_ref, wm_ref, vm_ref,
             wl_ref, bl_ref, o_ref, h_ref) = refs
        else:
            (x_ref, wf_ref, vf_ref, wl_ref, bl_ref, o_ref, h_ref) = refs

        i = pl.program_id(0)
        last = pl.num_programs(0) - 1

        def unit_vecs(vblock):
            # vblock: (V, h_p) f32 values.
            if flg_bn:
                return (vblock[0:1, :], vblock[1:2, :])   # gamma, beta
            return (vblock[0:1, :],)                      # bias

        @pl.when(i == 0)
        def _():
            h = _unit_compute(x_ref[...], wf_ref[...], unit_vecs(vf_ref[...]),
                              flg_bn, act)
            h_ref[...] = h.astype(h_ref.dtype)

        if n_mid > 0:
            # Number of real layers in the last (possibly partial) chunk.
            rem = n_mid - (n_chunks - 1) * lc

            @pl.when(i >= 1)
            def _():
                for j in range(lc):            # static unroll over the chunk
                    def apply_layer(j=j):
                        w_j = wm_ref[j]        # (h_p, h_p) bf16
                        v_j = vm_ref[j]        # (V, h_p)  f32
                        h = _unit_compute(h_ref[...], w_j, unit_vecs(v_j),
                                          flg_bn, act)
                        h_ref[...] = h.astype(h_ref.dtype)

                    if j < rem:                # present in every chunk
                        apply_layer()
                    else:                      # padded only in the last chunk
                        pl.when((i - 1) * lc + j < n_mid)(apply_layer)

        @pl.when(i == last)
        def _():
            # final Unit: flg_bn=False, act=None (matches Net.__init__).
            o = _unit_compute(h_ref[...], wl_ref[...], (bl_ref[...],),
                              False, None)
            o_ref[...] = o.astype(o_ref.dtype)

    return kernel


# ----------------------------------------------------------------------------
# Parameter preparation (done ONCE, outside the jitted forward).
# ----------------------------------------------------------------------------
def _pad_weight(w, k_pad, n_pad):
    """(n_out, n_in) torch layout -> zero-padded, transposed (k_pad, n_pad) bf16."""
    out = jnp.zeros((k_pad, n_pad), jnp.float32)
    out = out.at[: w.shape[1], : w.shape[0]].set(w.T)
    return out.astype(jnp.bfloat16)


def _pad_row(v, n_pad, fill=0.0):
    out = jnp.full((n_pad,), fill, jnp.float32)
    return out.at[: v.shape[0]].set(v)


def _choose_layers_per_chunk(n_mid, h_p):
    """Middle layers fused per grid step: amortise the ~0.35us/step overhead
    while keeping each double-buffered streamed weight chunk modest in VMEM."""
    if n_mid == 0:
        return 0, 0
    cap = max(1, _CHUNK_WEIGHT_BYTES // (h_p * h_p * 2))
    lc = int(max(1, min(n_mid, _MAX_UNROLL, cap)))
    n_chunks = -(-n_mid // lc)
    return lc, n_chunks


def prepare_net_params(params, n_in, n_out, n_hidden_node, *, flg_bn):
    """Pad to lane multiples, transpose, cast weights to bf16, stack middle
    layers, and pack the per-layer small vectors into one array."""
    # NOTE: n_in is padded to a full lane (128).  The first weight is resident
    # and DMA'd exactly once, so trimming its K padding saves only a few tens
    # of KiB; the known-good (8,128)-aligned layout is kept instead.
    in_p = _round_up(n_in, LANE)
    h_p = _round_up(n_hidden_node, LANE)
    out_p = _round_up(n_out, LANE)
    V = 2 if flg_bn else 1

    first, last, mids = params["first"], params["last"], params["middle"]
    n_mid = len(mids)
    lc, n_chunks = _choose_layers_per_chunk(n_mid, h_p)

    def unit_vecs(p):
        if flg_bn:   # rows [gamma, beta]; Linear bias dropped (cancels in BN)
            return jnp.stack([_pad_row(p["gamma"], h_p, 1.0),
                              _pad_row(p["beta"], h_p, 0.0)])
        return _pad_row(p["bias"], h_p, 0.0)[None, :]

    prep = {
        "wf": _pad_weight(first["weight"], in_p, h_p),
        "vf": unit_vecs(first),
        "wl": _pad_weight(last["weight"], h_p, out_p),
        "bl": _pad_row(last["bias"], out_p)[None, :],
    }
    if n_mid > 0:
        L = n_chunks * lc                          # padded; extras are masked
        wm = jnp.zeros((L, h_p, h_p), jnp.bfloat16)
        vm = jnp.zeros((L, V, h_p), jnp.float32)
        for k, p in enumerate(mids):
            wm = wm.at[k].set(_pad_weight(p["weight"], h_p, h_p))
            vm = vm.at[k].set(unit_vecs(p))
        prep["wm"], prep["vm"] = wm, vm

    meta = dict(n_mid=n_mid, layers_per_chunk=lc)
    return prep, meta


# ----------------------------------------------------------------------------
# Fused forward pass.
# ----------------------------------------------------------------------------
@functools.partial(
    jax.jit,
    static_argnames=("flg_bn", "act", "n_out", "n_mid", "layers_per_chunk"))
def net_forward(x, prep, *, flg_bn, act, n_out, n_mid, layers_per_chunk):
    B, n_in = x.shape
    in_p, h_p = prep["wf"].shape
    out_p = prep["wl"].shape[1]
    V = 2 if flg_bn else 1
    lc = layers_per_chunk
    n_chunks = (-(-n_mid // lc)) if n_mid > 0 else 0
    grid = (1 + n_chunks,)

    # Pad + cast the input once (padded weight rows are zero, so values in the
    # padded columns never matter); bf16 halves its DMA bytes and VMEM.
    x_p = jnp.zeros((B, in_p), jnp.float32).at[:, :n_in].set(x)
    x_p = x_p.astype(jnp.bfloat16)

    const2 = lambda i: (0, 0)
    mid3 = lambda i: (jnp.maximum(i - 1, 0), 0, 0)

    in_specs, args, blk_meta = [], [], []

    def add_input(arr, block_shape, index_map):
        args.append(arr)
        in_specs.append(pl.BlockSpec(block_shape, index_map))
        blk_meta.append((block_shape, arr.dtype.itemsize))

    add_input(x_p, (B, in_p), const2)               # input          (resident)
    add_input(prep["wf"], (in_p, h_p), const2)      # first weight   (resident)
    add_input(prep["vf"], (V, h_p), const2)         # first gamma/beta | bias
    if n_mid > 0:
        add_input(prep["wm"], (lc, h_p, h_p), mid3)  # streamed per chunk
        add_input(prep["vm"], (lc, V, h_p), mid3)    # streamed per chunk
    add_input(prep["wl"], (h_p, out_p), const2)     # last weight    (resident)
    add_input(prep["bl"], (1, out_p), const2)       # last bias

    # VMEM budget: TWO buffers per pallas-managed block (default double
    # buffering, even for constant-index residents) + the activation scratch.
    est_bytes = sum(2 * math.prod(s) * isz for s, isz in blk_meta)
    est_bytes += 2 * B * out_p * 4                  # output block, 2 buffers
    est_bytes += B * h_p * 2                        # bf16 activation slab

    vmem_budget = _vmem_capacity_bytes() * 3 // 4   # leave compiler headroom
    assert est_bytes < vmem_budget, (
        f"fused-net working set {est_bytes / 2**20:.1f} MiB exceeds "
        f"{vmem_budget / 2**20:.1f} MiB VMEM budget; reduce batch/hidden. "
        "TODO(synk): add batch tiling with a cross-tile BN reduction")
    vmem_limit = int(min(max(est_bytes * 5 // 4, 8 << 20), vmem_budget))

    out_padded = pl.pallas_call(
        _make_net_kernel(flg_bn, act, n_mid, n_chunks, lc),
        out_shape=jax.ShapeDtypeStruct((B, out_p), jnp.float32),
        grid=grid,
        in_specs=in_specs,
        out_specs=pl.BlockSpec((B, out_p), const2),
        scratch_shapes=[pltpu.VMEM((B, h_p), jnp.bfloat16)],  # activation slab
        compiler_params=_CompilerParams(
            dimension_semantics=("arbitrary",),     # layer chunks: sequential
            vmem_limit_bytes=vmem_limit),
    )(*args)

    return out_padded[:, :n_out]


# ----------------------------------------------------------------------------
# Deterministic parameter init (PyTorch-style U(-1/sqrt(fan_in), 1/sqrt(fan_in)))
# ----------------------------------------------------------------------------
def init_unit_params(key, n_in, n_out):
    kw, kb = jax.random.split(key)
    bound = 1.0 / jnp.sqrt(jnp.float32(n_in))
    return {
        "weight": jax.random.uniform(kw, (n_out, n_in), jnp.float32, -bound, bound),
        "bias": jax.random.uniform(kb, (n_out,), jnp.float32, -bound, bound),
        "gamma": jnp.ones((n_out,), jnp.float32),   # BatchNorm1d weight
        "beta": jnp.zeros((n_out,), jnp.float32),   # BatchNorm1d bias
    }


def init_net_params(key, n_in, n_out, n_hidden_node, n_hidden_layer):
    keys = jax.random.split(key, n_hidden_layer + 2)
    return {
        "first": init_unit_params(keys[0], n_in, n_hidden_node),
        "middle": [init_unit_params(keys[1 + k], n_hidden_node, n_hidden_node)
                   for k in range(n_hidden_layer)],
        "last": init_unit_params(keys[-1], n_hidden_node, n_out),
    }


def net_forward_reference(x, params, flg_bn, act):
    """Pure-JAX reference with the same bf16-matmul numerics.  It keeps the
    PyTorch Linear bias even under BN (it must cancel against the kernel)."""
    def unit(h, p, bn, a):
        y = jnp.dot(h.astype(jnp.bfloat16), p["weight"].T.astype(jnp.bfloat16),
                    preferred_element_type=jnp.float32) + p["bias"][None, :]
        if bn:
            mean = jnp.mean(y, axis=0, keepdims=True)
            var = jnp.mean(jnp.square(y - mean), axis=0, keepdims=True)
            y = (y - mean) * jax.lax.rsqrt(var + BN_EPS)
            y = y * p["gamma"][None, :] + p["beta"][None, :]
        return _apply_act(y, a, in_kernel=False)

    h = unit(x, params["first"], flg_bn, act)
    for p in params["middle"]:
        h = unit(h, p, flg_bn, act)
    return unit(h, params["last"], False, None)


if __name__ == "__main__":
    # Small shapes consistent with the module: batch=8, n_in=16, hidden=32,
    # n_hidden_layer=2, n_out=4; flg_bn=True, act='relu'.
    B, N_IN, N_HID, N_LAYER, N_OUT = 8, 16, 32, 2, 4
    FLG_BN, ACT = True, "relu"

    key = jax.random.PRNGKey(0)
    kx, kp = jax.random.split(key)
    x = jax.random.normal(kx, (B, N_IN), jnp.float32)
    raw_params = init_net_params(kp, N_IN, N_OUT, N_HID, N_LAYER)

    prep, meta = prepare_net_params(raw_params, N_IN, N_OUT, N_HID,
                                    flg_bn=FLG_BN)
    out = net_forward(x, prep, flg_bn=FLG_BN, act=ACT, n_out=N_OUT,
                      n_mid=meta["n_mid"],
                      layers_per_chunk=meta["layers_per_chunk"])
    jax.block_until_ready(out)

    assert out.shape == (B, N_OUT), out.shape
    ref = net_forward_reference(x, raw_params, FLG_BN, ACT)
    max_diff = float(jnp.max(jnp.abs(out - ref)))
    assert max_diff < 2e-2, f"mismatch vs reference: max|diff|={max_diff}"
    print("KERNEL_OK")
</pallas_src>

<mosaic_0001>
module attributes {stable_mosaic.version = 11 : i64} {
  func.func @kernel(%arg0: i32, %arg1: memref<8x128xbf16, #tpu.memory_space<vmem>>, %arg2: memref<128x128xbf16, #tpu.memory_space<vmem>>, %arg3: memref<2x128xf32, #tpu.memory_space<vmem>>, %arg4: memref<2x128x128xbf16, #tpu.memory_space<vmem>>, %arg5: memref<2x2x128xf32, #tpu.memory_space<vmem>>, %arg6: memref<128x128xbf16, #tpu.memory_space<vmem>>, %arg7: memref<1x128xf32, #tpu.memory_space<vmem>>, %arg8: memref<8x128xf32, #tpu.memory_space<vmem>>, %arg9: memref<8x128xbf16, #tpu.memory_space<vmem>>) attributes {dimension_semantics = [#tpu.dimension_semantics<arbitrary>], iteration_bounds = array<i64: 2>, scalar_prefetch = 0 : i64, scratch_operands = 1 : i64, tpu.core_type = #tpu.core_type<tc>, window_params = [{pipeline_mode = #tpu.pipeline_mode<synchronous>, transform_indices = @transform_0, window_bounds = array<i64: 8, 128>}, {pipeline_mode = #tpu.pipeline_mode<synchronous>, transform_indices = @transform_1, window_bounds = array<i64: 128, 128>}, {pipeline_mode = #tpu.pipeline_mode<synchronous>, transform_indices = @transform_2, window_bounds = array<i64: 2, 128>}, {transform_indices = @transform_3, window_bounds = array<i64: 2, 128, 128>}, {transform_indices = @transform_4, window_bounds = array<i64: 2, 2, 128>}, {pipeline_mode = #tpu.pipeline_mode<synchronous>, transform_indices = @transform_5, window_bounds = array<i64: 128, 128>}, {pipeline_mode = #tpu.pipeline_mode<synchronous>, transform_indices = @transform_6, window_bounds = array<i64: 1, 128>}, {pipeline_mode = #tpu.pipeline_mode<synchronous>, transform_indices = @transform_7, window_bounds = array<i64: 8, 128>}]} {
    %c0_i32 = arith.constant 0 : i32
    %0 = arith.cmpi eq, %arg0, %c0_i32 : i32
    %1 = arith.extui %0 : i1 to i32
    %c0_i32_0 = arith.constant 0 : i32
    %2 = arith.cmpi ne, %1, %c0_i32_0 : i32
    scf.if %2 {
      %c0 = arith.constant 0 : index
      %c0_4 = arith.constant 0 : index
      %9 = vector.load %arg1[%c0, %c0_4] : memref<8x128xbf16, #tpu.memory_space<vmem>>, vector<8x128xbf16>
      %c0_5 = arith.constant 0 : index
      %c0_6 = arith.constant 0 : index
      %10 = vector.load %arg2[%c0_5, %c0_6] : memref<128x128xbf16, #tpu.memory_space<vmem>>, vector<128x128xbf16>
      %c0_7 = arith.constant 0 : index
      %c0_8 = arith.constant 0 : index
      %11 = vector.load %arg3[%c0_7, %c0_8] : memref<2x128xf32, #tpu.memory_space<vmem>>, vector<2x128xf32>
      %12 = vector.extract_strided_slice %11 {offsets = [0, 0], sizes = [1, 128], strides = [1, 1]} : vector<2x128xf32> to vector<1x128xf32>
      %13 = vector.extract_strided_slice %11 {offsets = [1, 0], sizes = [1, 128], strides = [1, 1]} : vector<2x128xf32> to vector<1x128xf32>
      %cst = arith.constant dense<0.000000e+00> : vector<8x128xf32>
      %14 = tpu.matmul %9, %10, %cst {dimension_numbers = #tpu.dot_dimension_numbers<[1], [0], [0], [1], [0, 0, 1, 1], [], []>} : vector<8x128xbf16>, vector<128x128xbf16>, vector<8x128xf32> -> vector<8x128xf32>
      %cst_9 = arith.constant dense<0.000000e+00> : vector<128xf32>
      %15 = vector.multi_reduction <add>, %14, %cst_9 [0] : vector<8x128xf32> to vector<128xf32>
      %16 = vector.shape_cast %15 : vector<128xf32> to vector<1x128xf32>
      %cst_10 = arith.constant 8.000000e+00 : f32
      %17 = vector.broadcast %cst_10 : f32 to vector<1x128xf32>
      %18 = arith.divf %16, %17 : vector<1x128xf32>
      %19 = vector.broadcast %18 : vector<1x128xf32> to vector<8x128xf32>
      %20 = arith.subf %14, %19 : vector<8x128xf32>
      %21 = arith.mulf %20, %20 : vector<8x128xf32>
      %cst_11 = arith.constant dense<0.000000e+00> : vector<128xf32>
      %22 = vector.multi_reduction <add>, %21, %cst_11 [0] : vector<8x128xf32> to vector<128xf32>
      %23 = vector.shape_cast %22 : vector<128xf32> to vector<1x128xf32>
      %cst_12 = arith.constant 8.000000e+00 : f32
      %24 = vector.broadcast %cst_12 : f32 to vector<1x128xf32>
      %25 = arith.divf %23, %24 : vector<1x128xf32>
      %cst_13 = arith.constant 9.99999974E-6 : f32
      %26 = vector.broadcast %cst_13 : f32 to vector<1x128xf32>
      %27 = arith.addf %25, %26 : vector<1x128xf32>
      %28 = math.rsqrt %27 : vector<1x128xf32>
      %29 = arith.mulf %12, %28 : vector<1x128xf32>
      %30 = vector.broadcast %29 : vector<1x128xf32> to vector<8x128xf32>
      %31 = arith.mulf %20, %30 : vector<8x128xf32>
      %32 = vector.broadcast %13 : vector<1x128xf32> to vector<8x128xf32>
      %33 = arith.addf %31, %32 : vector<8x128xf32>
      %cst_14 = arith.constant 0.000000e+00 : f32
      %34 = vector.broadcast %cst_14 : f32 to vector<8x128xf32>
      %35 = arith.maximumf %33, %34 : vector<8x128xf32>
      %36 = arith.truncf %35 : vector<8x128xf32> to vector<8x128xbf16>
      %c0_15 = arith.constant 0 : index
      %c0_16 = arith.constant 0 : index
      %37 = vector.load %arg9[%c0_15, %c0_16] : memref<8x128xbf16, #tpu.memory_space<vmem>>, vector<8x128xbf16>
      tpu.vector_store %arg9[%c0_15, %c0_16], %36 {strides = array<i32>} : memref<8x128xbf16, #tpu.memory_space<vmem>>, vector<8x128xbf16>,
    } else {
    }
    %c1_i32 = arith.constant 1 : i32
    %3 = arith.cmpi sge, %arg0, %c1_i32 : i32
    %4 = arith.extui %3 : i1 to i32
    %c0_i32_1 = arith.constant 0 : i32
    %5 = arith.cmpi ne, %4, %c0_i32_1 : i32
    scf.if %5 {
      %c0 = arith.constant 0 : index
      %c0_4 = arith.constant 0 : index
      %c0_5 = arith.constant 0 : index
      %9 = vector.load %arg4[%c0, %c0_4, %c0_5] : memref<2x128x128xbf16, #tpu.memory_space<vmem>>, vector<1x128x128xbf16>
      %10 = vector.shape_cast %9 : vector<1x128x128xbf16> to vector<128x128xbf16>
      %c0_6 = arith.constant 0 : index
      %c0_7 = arith.constant 0 : index
      %c0_8 = arith.constant 0 : index
      %11 = vector.load %arg5[%c0_6, %c0_7, %c0_8] : memref<2x2x128xf32, #tpu.memory_space<vmem>>, vector<1x2x128xf32>
      %12 = vector.shape_cast %11 : vector<1x2x128xf32> to vector<2x128xf32>
      %c0_9 = arith.constant 0 : index
      %c0_10 = arith.constant 0 : index
      %13 = vector.load %arg9[%c0_9, %c0_10] : memref<8x128xbf16, #tpu.memory_space<vmem>>, vector<8x128xbf16>
      %14 = vector.extract_strided_slice %12 {offsets = [0, 0], sizes = [1, 128], strides = [1, 1]} : vector<2x128xf32> to vector<1x128xf32>
      %15 = vector.extract_strided_slice %12 {offsets = [1, 0], sizes = [1, 128], strides = [1, 1]} : vector<2x128xf32> to vector<1x128xf32>
      %cst = arith.constant dense<0.000000e+00> : vector<8x128xf32>
      %16 = tpu.matmul %13, %10, %cst {dimension_numbers = #tpu.dot_dimension_numbers<[1], [0], [0], [1], [0, 0, 1, 1], [], []>} : vector<8x128xbf16>, vector<128x128xbf16>, vector<8x128xf32> -> vector<8x128xf32>
      %cst_11 = arith.constant dense<0.000000e+00> : vector<128xf32>
      %17 = vector.multi_reduction <add>, %16, %cst_11 [0] : vector<8x128xf32> to vector<128xf32>
      %18 = vector.shape_cast %17 : vector<128xf32> to vector<1x128xf32>
      %cst_12 = arith.constant 8.000000e+00 : f32
      %19 = vector.broadcast %cst_12 : f32 to vector<1x128xf32>
      %20 = arith.divf %18, %19 : vector<1x128xf32>
      %21 = vector.broadcast %20 : vector<1x128xf32> to vector<8x128xf32>
      %22 = arith.subf %16, %21 : vector<8x128xf32>
      %23 = arith.mulf %22, %22 : vector<8x128xf32>
      %cst_13 = arith.constant dense<0.000000e+00> : vector<128xf32>
      %24 = vector.multi_reduction <add>, %23, %cst_13 [0] : vector<8x128xf32> to vector<128xf32>
      %25 = vector.shape_cast %24 : vector<128xf32> to vector<1x128xf32>
      %cst_14 = arith.constant 8.000000e+00 : f32
      %26 = vector.broadcast %cst_14 : f32 to vector<1x128xf32>
      %27 = arith.divf %25, %26 : vector<1x128xf32>
      %cst_15 = arith.constant 9.99999974E-6 : f32
      %28 = vector.broadcast %cst_15 : f32 to vector<1x128xf32>
      %29 = arith.addf %27, %28 : vector<1x128xf32>
      %30 = math.rsqrt %29 : vector<1x128xf32>
      %31 = arith.mulf %14, %30 : vector<1x128xf32>
      %32 = vector.broadcast %31 : vector<1x128xf32> to vector<8x128xf32>
      %33 = arith.mulf %22, %32 : vector<8x128xf32>
      %34 = vector.broadcast %15 : vector<1x128xf32> to vector<8x128xf32>
      %35 = arith.addf %33, %34 : vector<8x128xf32>
      %cst_16 = arith.constant 0.000000e+00 : f32
      %36 = vector.broadcast %cst_16 : f32 to vector<8x128xf32>
      %37 = arith.maximumf %35, %36 : vector<8x128xf32>
      %38 = arith.truncf %37 : vector<8x128xf32> to vector<8x128xbf16>
      %c0_17 = arith.constant 0 : index
      %c0_18 = arith.constant 0 : index
      %39 = vector.load %arg9[%c0_17, %c0_18] : memref<8x128xbf16, #tpu.memory_space<vmem>>, vector<8x128xbf16>
      tpu.vector_store %arg9[%c0_17, %c0_18], %38 {strides = array<i32>} : memref<8x128xbf16, #tpu.memory_space<vmem>>, vector<8x128xbf16>,
      %c1 = arith.constant 1 : index
      %c0_19 = arith.constant 0 : index
      %c0_20 = arith.constant 0 : index
      %40 = vector.load %arg4[%c1, %c0_19, %c0_20] : memref<2x128x128xbf16, #tpu.memory_space<vmem>>, vector<1x128x128xbf16>
      %41 = vector.shape_cast %40 : vector<1x128x128xbf16> to vector<128x128xbf16>
      %c1_21 = arith.constant 1 : index
      %c0_22 = arith.constant 0 : index
      %c0_23 = arith.constant 0 : index
      %42 = vector.load %arg5[%c1_21, %c0_22, %c0_23] : memref<2x2x128xf32, #tpu.memory_space<vmem>>, vector<1x2x128xf32>
      %43 = vector.shape_cast %42 : vector<1x2x128xf32> to vector<2x128xf32>
      %c0_24 = arith.constant 0 : index
      %c0_25 = arith.constant 0 : index
      %44 = vector.load %arg9[%c0_24, %c0_25] : memref<8x128xbf16, #tpu.memory_space<vmem>>, vector<8x128xbf16>
      %45 = vector.extract_strided_slice %43 {offsets = [0, 0], sizes = [1, 128], strides = [1, 1]} : vector<2x128xf32> to vector<1x128xf32>
      %46 = vector.extract_strided_slice %43 {offsets = [1, 0], sizes = [1, 128], strides = [1, 1]} : vector<2x128xf32> to vector<1x128xf32>
      %cst_26 = arith.constant dense<0.000000e+00> : vector<8x128xf32>
      %47 = tpu.matmul %44, %41, %cst_26 {dimension_numbers = #tpu.dot_dimension_numbers<[1], [0], [0], [1], [0, 0, 1, 1], [], []>} : vector<8x128xbf16>, vector<128x128xbf16>, vector<8x128xf32> -> vector<8x128xf32>
      %cst_27 = arith.constant dense<0.000000e+00> : vector<128xf32>
      %48 = vector.multi_reduction <add>, %47, %cst_27 [0] : vector<8x128xf32> to vector<128xf32>
      %49 = vector.shape_cast %48 : vector<128xf32> to vector<1x128xf32>
      %cst_28 = arith.constant 8.000000e+00 : f32
      %50 = vector.broadcast %cst_28 : f32 to vector<1x128xf32>
      %51 = arith.divf %49, %50 : vector<1x128xf32>
      %52 = vector.broadcast %51 : vector<1x128xf32> to vector<8x128xf32>
      %53 = arith.subf %47, %52 : vector<8x128xf32>
      %54 = arith.mulf %53, %53 : vector<8x128xf32>
      %cst_29 = arith.constant dense<0.000000e+00> : vector<128xf32>
      %55 = vector.multi_reduction <add>, %54, %cst_29 [0] : vector<8x128xf32> to vector<128xf32>
      %56 = vector.shape_cast %55 : vector<128xf32> to vector<1x128xf32>
      %cst_30 = arith.constant 8.000000e+00 : f32
      %57 = vector.broadcast %cst_30 : f32 to vector<1x128xf32>
      %58 = arith.divf %56, %57 : vector<1x128xf32>
      %cst_31 = arith.constant 9.99999974E-6 : f32
      %59 = vector.broadcast %cst_31 : f32 to vector<1x128xf32>
      %60 = arith.addf %58, %59 : vector<1x128xf32>
      %61 = math.rsqrt %60 : vector<1x128xf32>
      %62 = arith.mulf %45, %61 : vector<1x128xf32>
      %63 = vector.broadcast %62 : vector<1x128xf32> to vector<8x128xf32>
      %64 = arith.mulf %53, %63 : vector<8x128xf32>
      %65 = vector.broadcast %46 : vector<1x128xf32> to vector<8x128xf32>
      %66 = arith.addf %64, %65 : vector<8x128xf32>
      %cst_32 = arith.constant 0.000000e+00 : f32
      %67 = vector.broadcast %cst_32 : f32 to vector<8x128xf32>
      %68 = arith.maximumf %66, %67 : vector<8x128xf32>
      %69 = arith.truncf %68 : vector<8x128xf32> to vector<8x128xbf16>
      %c0_33 = arith.constant 0 : index
      %c0_34 = arith.constant 0 : index
      %70 = vector.load %arg9[%c0_33, %c0_34] : memref<8x128xbf16, #tpu.memory_space<vmem>>, vector<8x128xbf16>
      tpu.vector_store %arg9[%c0_33, %c0_34], %69 {strides = array<i32>} : memref<8x128xbf16, #tpu.memory_space<vmem>>, vector<8x128xbf16>,
    } else {
    }
    %c1_i32_2 = arith.constant 1 : i32
    %6 = arith.cmpi eq, %arg0, %c1_i32_2 : i32
    %7 = arith.extui %6 : i1 to i32
    %c0_i32_3 = arith.constant 0 : i32
    %8 = arith.cmpi ne, %7, %c0_i32_3 : i32
    scf.if %8 {
      %c0 = arith.constant 0 : index
      %c0_4 = arith.constant 0 : index
      %9 = vector.load %arg9[%c0, %c0_4] : memref<8x128xbf16, #tpu.memory_space<vmem>>, vector<8x128xbf16>
      %c0_5 = arith.constant 0 : index
      %c0_6 = arith.constant 0 : index
      %10 = vector.load %arg6[%c0_5, %c0_6] : memref<128x128xbf16, #tpu.memory_space<vmem>>, vector<128x128xbf16>
      %c0_7 = arith.constant 0 : index
      %c0_8 = arith.constant 0 : index
      %11 = vector.load %arg7[%c0_7, %c0_8] : memref<1x128xf32, #tpu.memory_space<vmem>>, vector<1x128xf32>
      %cst = arith.constant dense<0.000000e+00> : vector<8x128xf32>
      %12 = tpu.matmul %9, %10, %cst {dimension_numbers = #tpu.dot_dimension_numbers<[1], [0], [0], [1], [0, 0, 1, 1], [], []>} : vector<8x128xbf16>, vector<128x128xbf16>, vector<8x128xf32> -> vector<8x128xf32>
      %13 = vector.broadcast %11 : vector<1x128xf32> to vector<8x128xf32>
      %14 = arith.addf %12, %13 : vector<8x128xf32>
      %c0_9 = arith.constant 0 : index
      %c0_10 = arith.constant 0 : index
      %15 = vector.load %arg8[%c0_9, %c0_10] : memref<8x128xf32, #tpu.memory_space<vmem>>, vector<8x128xf32>
      tpu.vector_store %arg8[%c0_9, %c0_10], %14 {strides = array<i32>} : memref<8x128xf32, #tpu.memory_space<vmem>>, vector<8x128xf32>,
    } else {
    }
    return
  }
  func.func @transform_0(%arg0: i32) -> (i32, i32) {
    %c0_i32 = arith.constant 0 : i32
    %c0_i32_0 = arith.constant 0 : i32
    %c0_i32_1 = arith.constant 0 : i32
    return %c0_i32, %c0_i32_0 : i32, i32
  }
  func.func @transform_1(%arg0: i32) -> (i32, i32) {
    %c0_i32 = arith.constant 0 : i32
    %c0_i32_0 = arith.constant 0 : i32
    %c0_i32_1 = arith.constant 0 : i32
    return %c0_i32, %c0_i32_0 : i32, i32
  }
  func.func @transform_2(%arg0: i32) -> (i32, i32) {
    %c0_i32 = arith.constant 0 : i32
    %c0_i32_0 = arith.constant 0 : i32
    %c0_i32_1 = arith.constant 0 : i32
    return %c0_i32, %c0_i32_0 : i32, i32
  }
  func.func @transform_3(%arg0: i32) -> (i32, i32, i32) {
    %c1_i32 = arith.constant 1 : i32
    %0 = arith.subi %arg0, %c1_i32 : i32
    %c0_i32 = arith.constant 0 : i32
    %1 = arith.maxsi %0, %c0_i32 : i32
    %c0_i32_0 = arith.constant 0 : i32
    %c0_i32_1 = arith.constant 0 : i32
    %c0_i32_2 = arith.constant 0 : i32
    return %1, %c0_i32_0, %c0_i32_1 : i32, i32, i32
  }
  func.func @transform_4(%arg0: i32) -> (i32, i32, i32) {
    %c1_i32 = arith.constant 1 : i32
    %0 = arith.subi %arg0, %c1_i32 : i32
    %c0_i32 = arith.constant 0 : i32
    %1 = arith.maxsi %0, %c0_i32 : i32
    %c0_i32_0 = arith.constant 0 : i32
    %c0_i32_1 = arith.constant 0 : i32
    %c0_i32_2 = arith.constant 0 : i32
    return %1, %c0_i32_0, %c0_i32_1 : i32, i32, i32
  }
  func.func @transform_5(%arg0: i32) -> (i32, i32) {
    %c0_i32 = arith.constant 0 : i32
    %c0_i32_0 = arith.constant 0 : i32
    %c0_i32_1 = arith.constant 0 : i32
    return %c0_i32, %c0_i32_0 : i32, i32
  }
  func.func @transform_6(%arg0: i32) -> (i32, i32) {
    %c0_i32 = arith.constant 0 : i32
    %c0_i32_0 = arith.constant 0 : i32
    %c0_i32_1 = arith.constant 0 : i32
    return %c0_i32, %c0_i32_0 : i32, i32
  }
  func.func @transform_7(%arg0: i32) -> (i32, i32) {
    %c0_i32 = arith.constant 0 : i32
    %c0_i32_0 = arith.constant 0 : i32
    %c0_i32_1 = arith.constant 0 : i32
    return %c0_i32, %c0_i32_0 : i32, i32
  }
}

</mosaic_0001>

<bundles_post_ra>
// kernel: net_forward.1
= control target key start
LH: loop header
LB: loop body
LE: loop exit
PB: predicated region body
PF: predicated region fallthrough
CT: control target
= control target key end

     0   :  { %12 = vsyncpa [#allocation4], 0  ;;  %s1534_s0 = inlined_call_operand.vmem [shape: bf16[8,128], index: 0, kind: input, shape index: {}]   ;;  %s1535_s1 = inlined_call_operand.hbm [shape: bf16[128,128], index: 1, kind: input, shape index: {}]   ;;  %s1536_s2 = inlined_call_operand.vmem [shape: f32[2,128], index: 2, kind: input, shape index: {}]   ;;  %s1537_s3 = inlined_call_operand.hbm [shape: bf16[2,128,128], index: 3, kind: input, shape index: {}]   ;;  %s1538_s4 = inlined_call_operand.vmem [shape: f32[2,2,128], index: 4, kind: input, shape index: {}]   ;;  %s1539_s5 = inlined_call_operand.hbm [shape: bf16[128,128], index: 5, kind: input, shape index: {}]   ;;  %s1540_s6 = inlined_call_operand.vmem [shape: f32[1,128], index: 6, kind: input, shape index: {}]   ;;  %s1541_s7 = inlined_call_operand.vmem [shape: f32[8,128], index: 7, kind: output, shape index: {}]  }
   0x1   :  { %13 = vsyncpa [#allocation6], 0 }
   0x2   :  { %15 = vsyncpa [#allocation6 + $0x1], 0  ;;  %s1361_s24 = smov 0   ;;  %s1363_s25 = smov 0  }
   0x3   :  { %s1365_s26 = smov 0   ;;  %s1367_s27 = smov 0  }
   0x4 LB: > { %s1380_s28 = sadd.s32 4294967295, %s1313_s27   ;;  %p110_p0 = scmp.ne.s32.totalorder %s1305_s25, %s1301_s24  ;;  %s1313_s27 = sphi %s1367_s27, %s1553_s27   ;;  %s1309_s26 = sphi %s1365_s26, %s1552_s26   ;;  %s1305_s25 = sphi %s1363_s25, %s1551_s25   ;;  %s1301_s24 = sphi %s1361_s24, %s1550_s24  }
   0x5   : > { %p111_p1 = scmp.eq.s32.totalorder %s1380_s28, 0  ;;  %p906_p2 = scmp.ge.s32.totalorder %s1313_s27, 1 }
   0x6   : > { %p216_p3 = scmp.lt.s32.totalorder %s1313_s27, 3  ;;  %p907_p4 = scmp.ne.s32.totalorder %s1380_s28, 0 }
   0x7   : > { %p1389_p5 = por %p111_p1, %p110_p0  ;;  %s247_s10 = sshll.u32 %s1539_s5, 4  ;;  %s248_s10 = int_to_ptr.hbm [resolvable:$true] %s247_s10 }
   0x8   : > { %p1393_p6 = pnand %p906_p2, %p216_p3  ;;  %s1315_s11 = smov [#allocation7]  }
   0x9   : > { %s249_s12 = sshll.u32 %s1315_s11, 4  ;;  %s230_s15 = sshll.u32 %s1535_s1, 4  ;;  %s250_s12 = int_to_ptr.vmem [resolvable:$true] %s249_s12  ;;  %s231_s15 = int_to_ptr.hbm [resolvable:$true] %s230_s15 }
   0xa   : > { %p1116_p7 = pneg %p1393_p6  ;;  %s1542_s16 = smov 64  }
   0xb   : > { %s1543_s17 = smov 4   ;;  %s1318_s18 = smov [#allocation3]  }
   0xc   : > { %p1117_p8 = pnand %p1116_p7, %p111_p1  ;;  %s232_s19 = sshll.u32 %s1318_s18, 4  ;;  %s233_s19 = int_to_ptr.vmem [resolvable:$true] %s232_s19 }
   0xd   : > { %s1414_s20 = sadd.s32 1, %s1313_s27   ;;  %p89_p9 = scmp.gt.s32.totalorder %s1380_s28, 0 }
   0xe   : > { %1122 = dma.hbm_to_vmem [thread:$0]  (!%p1117_p8), %s248_s10, 1024, %s250_s12, [#allocation6], %s1542_s16, %s1542_s16, %s1543_s17  }
   0xf   : > { %1119 = dma.hbm_to_vmem [thread:$0]  (!%p1117_p8), %s231_s15, 1024, %s233_s19, [#allocation4], %s1542_s16, %s1542_s16, %s1543_s17  }
  0x10   : > { %s903_s21 = sadd.s32 4294967295, %s1414_s20  ;;  %p104_p11 = scmp.ne.s32.totalorder %s1309_s26, %s1305_s25 }
  0x11   : > { %s90_s22 = scalar_select %p89_p9, %s1380_s28, 0 }
  0x12   : > { %p92_p10 = scmp.gt.s32.totalorder %s903_s21, 0  ;;  %s97_s23 = sadd.s32 1, %s1309_s26 }
  0x13   : > { %p105_p12 = scmp.eq.s32.totalorder %s1313_s27, 0  ;;  %p1129_p0 = scmp.lt.s32.totalorder %s1313_s27, 2 }
  0x14   : > { %s1555_s21 = smov (!%p92_p10, %s903_s21), 0  ;;  %s266_s9 = sand.u32 1, %s1313_s27  }
  0x15   : > { %p1423_p13 = por %p105_p12, %p104_p11  ;;  %s94_s8 = ssub.s32 %s90_s22, %s1555_s21 }
  0x16   : > { %p95_p2 = scmp.eq.s32.totalorder %s94_s8, 0  ;;  %s268_s10 = sand.u32 1, %s1309_s26  }
  0x17   : > { %s910_s11 = sshll.u32 %s268_s10, 7  ;;  %s1073_s12 = sshll.u32 %s90_s22, 7 }
  0x18   : > { %s1431_s13 = scalar_select %p95_p2, %s1309_s26, %s97_s23  }
  0x19   : > { %s279_s18 = scalar_lea.hbm %s1537_s3, %s1073_s12  ;;  %s270_s16 = scalar_lea.vmem [#allocation5], %s910_s11 }
  0x1a   : > { %s280_s19 = sshll.u32 %s279_s18, 4  ;;  %s282_s17 = sshll.u32 %s270_s16, 4  ;;  %s281_s19 = int_to_ptr.hbm [resolvable:$true] %s280_s19  ;;  %s283_s17 = int_to_ptr.vmem [resolvable:$true] %s282_s17 }
  0x1b   : > { %p1440_p3 = pnand %p1129_p0, %p1423_p13  ;;  %s267_s8 = scalar_lea.sflag [#allocation6], %s266_s9 }
  0x1c   : > { %s1241_s22 = sshra.s32 %s281_s19, 4  ;;  %s1248_s11 = scalar_lea.hbm %s1537_s3, 128  ;;  %s1242_s22 = int_to_ptr.hbm [resolvable:$true] %s1241_s22 }
  0x1d   : > { %s1243_s23 = scalar_lea.hbm %s1242_s22, 128  ;;  %p1245_p8 = pneg %p1440_p3 }
  0x1e   : > { %p1244_p7 = scmp.ne.s32.totalorder %s1242_s22, %s1243_s23  ;;  %p1249_p11 = scmp.lt.s32.totalorder %s1242_s22, %s1537_s3 }
  0x1f   : > { %p1250_p12 = scmp.lt.s32.totalorder %s1248_s11, %s1243_s23 }
  0x20   : > { %p1246_p9 = pnand %p1245_p8, %p1244_p7 }
  0x21   : > { %p1251_p13 = por %p1250_p12, %p1249_p11 }
  0x22   : > { %p1247_p10 = pneg %p1246_p9 }
  0x24   : > { %p1252_p0 = pnand %p1251_p13, %p1247_p10 }
  0x26   : > { %1255 = shalt.err (!%p1252_p0)
}
  0x27   : > { %s1548_s9 = smov 4   ;;  %s1549_s12 = smov 64  }
  0x28   : > { %1126 = dma.hbm_to_vmem [thread:$0]  (!%p1440_p3), %s281_s19, 2048, %s283_s17, %s267_s8, %s1549_s12, %s1549_s12, %s1548_s9  }
  0x29   : > { %309 = sbr.rel (%p1393_p6) target bundleno = 887 (0x377), region = 48 }
  0x2e   : > { %1288 = dma.done.wait (%p111_p1), [#allocation4], 1024  }
  0x2f   : > { %1290 = vsyncadd (%p111_p1), [#allocation4], 4294966272  ;;  %s316_s14 = sand.u32 1, %s1380_s28   ;;  %s318_s15 = sand.u32 1, %s1305_s25  }
  0x30   : > { %s917_s18 = sshll.u32 %s318_s15, 7  ;;  %s317_s21 = scalar_lea.sflag [#allocation6], %s316_s14 }
  0x31   : > { %s1465_s22 = scalar_lea.vmem [#allocation5], %s917_s18 }
  0x32   : > { %1292 = dma.done.wait (%p1389_p5), %s317_s21, 2048  }
  0x33   : > { %1294 = vsyncadd (%p1389_p5), %s317_s21, 4294965248 }
  0x34   : > { %1296 = dma.done.wait (%p111_p1), [#allocation6], 1024  }
  0x35   : > { %1298 = vsyncadd (%p111_p1), [#allocation6], 4294966272  ;;  %s919_s30 = sadd.s32 4294967295, %s1380_s28 }
  0x36   : > { %p365_p6 = scmp.gt.s32.totalorder %s919_s30, 0 }
  0x38   : > { %s1557_s30 = smov (!%p365_p6, %s919_s30), 0 }
  0x39   : > { %s920_s17 = sshll.u32 %s1557_s30, 1 }
  0x3a   : > { %p368_p2 = scmp.lt.s32.totalorder %s920_s17, 1  ;;  %379 = sbr.rel (%p907_p4) target bundleno = 286 (0x11e), region = 64 }
  0x3c   : > { %s1559_s17 = smov (!%p368_p2, %s920_s17), 1 }
  0x3d   : > { %s921_s19 = sshll.u32 %s1559_s17, 1 }
  0x3e   : > { %s1479_s10 = scalar_lea.vmem %s1538_s4, %s921_s19 }
  0x3f   : > { %v1081_v0 = vld [vmem:[#allocation3 + $0x38] sm:$0xff]  ;;  %v1080_v1 = vld [vmem:[#allocation3 + $0x30] sm:$0xff]  ;;  %v1079_v2 = vld [vmem:[#allocation3 + $0x28] sm:$0xff]  ;;  %v1319_v9 = vmov 8.0  }
  0x40   : > { %446 = vmatpush.bf16.msra.mxu0 %v1081_v0  ;;  %v1078_v3 = vld [vmem:[#allocation3 + $0x20] sm:$0xff]  ;;  %v1077_v4 = vld [vmem:[#allocation3 + $0x18] sm:$0xff]  ;;  %v1076_v5 = vld [vmem:[#allocation3 + $0x10] sm:$0xff]  ;;  %1170 = vrcp.f32 %v1319_v9 }
  0x41   : > { %v1075_v6 = vld [vmem:[#allocation3 + $0x8] sm:$0xff]  ;;  %v1074_v7 = vld [vmem:[#allocation3] sm:$0xff]  ;;  %v380_v8 = vld [vmem:[%s1534_s0] sm:$0xf] }
  0x42   : > { %v397_v40 = vld [vmem:[%s1536_s2] sm:$0x3] }
  0x43   : > { %v496_v45 = vperm.slane %v397_v40, 1 }
  0x44   : > { %447 = vmatpush.bf16.msra.mxu0 %v1080_v1 }
  0x46   : > { %v1171_v10 = vpop.eup %1170 }
  0x47   : > { %v466_v11 = vmul.f32 8.0, %v1171_v10  ;;  %vm470_vm0 = vweird.f32 %v1171_v10 }
  0x48   : > { %448 = vmatpush.bf16.msra.mxu0 %v1079_v2 }
  0x49   : > { %v467_v12 = vsub.f32 1.0, %v466_v11 }
  0x4b   : > { %v468_v15 = vmul.f32 %v1171_v10, %v467_v12 }
  0x4c   : > { %449 = vmatpush.bf16.msra.mxu0 %v1078_v3 }
  0x4d   : > { %v469_v18 = vadd.f32 %v1171_v10, %v468_v15 }
  0x4f   : > { %v471_v22 = vsel %vm470_vm0, %v1171_v10, %v469_v18 }
  0x50   : > { %450 = vmatpush.bf16.msra.mxu0 %v1077_v4 }
  0x54   : > { %451 = vmatpush.bf16.msra.mxu0 %v1076_v5 }
  0x58   : > { %452 = vmatpush.bf16.msra.mxu0 %v1075_v6 }
  0x5c   : > { %453 = vmatpush.bf16.msra.mxu0 %v1074_v7 }
  0x5f   : > { %454 = vmatmul.bf16.vlgmr.msra.gmra.mxu0 %v380_v8 }
  0xdc   : > { %v455_v13 = vpop.f32.mrf.mxu0 }
  0xdd   : > { %v459_v14 = vrot.slane %v455_v13, 4 }
  0xdf   : > { %v460_v16 = vadd.f32 %v459_v14, %v455_v13 }
  0xe1   : > { %v461_v17 = vrot.slane %v460_v16, 2 }
  0xe3   : > { %v462_v19 = vadd.f32 %v461_v17, %v460_v16 }
  0xe4   : > { %v457_v20 = vpop.f32.mrf.mxu0 }
  0xe5   : > { %v463_v21 = vrot.slane %v462_v19, 1 }
  0xe7   : > { %v464_v23 = vadd.f32 %v463_v21, %v462_v19 }
  0xe9   : > { %v472_v24 = vmul.f32 %v471_v22, %v464_v23 }
  0xeb   : > { %v473_v25 = vsub.f32 %v455_v13, %v472_v24 }
  0xed   : > { %v474_v26 = vmul.f32 %v473_v25, %v473_v25 }
  0xef   : > { %v475_v27 = vrot.slane %v474_v26, 4 }
  0xf1   : > { %v476_v28 = vadd.f32 %v475_v27, %v474_v26 }
  0xf3   : > { %v477_v29 = vrot.slane %v476_v28, 2 }
  0xf5   : > { %v478_v30 = vadd.f32 %v477_v29, %v476_v28 }
  0xf7   : > { %v479_v31 = vrot.slane %v478_v30, 1 }
  0xf9   : > { %v480_v32 = vadd.f32 %v479_v31, %v478_v30 }
  0xfb   : > { %v481_v33 = vmul.f32 %v480_v32, %v471_v22 }
  0xfd   : > { %v482_v34 = vadd.f32 1e-05, %v481_v33 }
  0xff   : > { %1172 = vrsqrt.f32 %v482_v34  ;;  %vm489_vm2 = vweird.f32 %v482_v34 }
 0x105   : > { %v1173_v35 = vpop.eup %1172 }
 0x106   : > { %v484_v36 = vmul.f32 %v1173_v35, %v482_v34  ;;  %vm490_vm1 = vweird.f32 %v1173_v35 }
 0x107   : > { %vm491_vm3 = vmor %vm489_vm2, %vm490_vm1 }
 0x108   : > { %v485_v37 = vmul.f32 %v1173_v35, %v484_v36 }
 0x10a   : > { %v486_v38 = vmul.f32 0.5, %v485_v37 }
 0x10c   : > { %v487_v39 = vsub.f32 1.5, %v486_v38 }
 0x10e   : > { %v488_v41 = vmul.f32 %v1173_v35, %v487_v39 }
 0x110   : > { %v492_v42 = vsel %vm491_vm3, %v1173_v35, %v488_v41 }
 0x111   : > { %v493_v43 = vmul.f32 %v492_v42, %v397_v40 }
 0x113   : > { %v494_v44 = vperm.slane %v493_v43, 0 }
 0x115   : > { %v495_v46 = vmul.f32 %v494_v44, %v473_v25 }
 0x117   : > { %v497_v47 = vadd.f32 %v496_v45, %v495_v46 }
 0x119   : > { %v498_v48 = vmax.f32 %v497_v47, 0.0 }
 0x11b   : > { %v499_v49 = vpack.c.bf16 %v498_v48, %v498_v48 }
 0x11d   : > { %500 = vst [vmem:[#allocation2] sm:$0xf] %v499_v49 }
 0x11e PF: > { %p955_p1 = scmp.lt.s32.totalorder %s1380_s28, 1 }
 0x120   : > { %504 = sbr.rel (%p955_p1) target bundleno = 714 (0x2ca), region = 68 }
 0x125   : > { %v1089_v50 = vld [vmem:[%s1465_s22 + $0x38] sm:$0xff]  ;;  %v1088_v51 = vld [vmem:[%s1465_s22 + $0x30] sm:$0xff]  ;;  %v1087_v52 = vld [vmem:[%s1465_s22 + $0x28] sm:$0xff]  ;;  %v1320_v59 = vmov 8.0  }
 0x126   : > { %571 = vmatpush.bf16.msra.mxu0 %v1089_v50  ;;  %v1086_v53 = vld [vmem:[%s1465_s22 + $0x20] sm:$0xff]  ;;  %v1085_v54 = vld [vmem:[%s1465_s22 + $0x18] sm:$0xff]  ;;  %v1084_v55 = vld [vmem:[%s1465_s22 + $0x10] sm:$0xff]  ;;  %1174 = vrcp.f32 %v1320_v59 }
 0x127   : > { %v1083_v56 = vld [vmem:[%s1465_s22 + $0x8] sm:$0xff]  ;;  %v1082_v57 = vld [vmem:[%s1465_s22] sm:$0xff]  ;;  %v522_v58 = vld [vmem:[#allocation2] sm:$0xf] }
 0x128   : > { %v1097_v7 = vld [vmem:[%s1465_s22 + $0x78] sm:$0xff]  ;;  %v1096_v11 = vld [vmem:[%s1465_s22 + $0x70] sm:$0xff]  ;;  %v1095_v14 = vld [vmem:[%s1465_s22 + $0x68] sm:$0xff] }
 0x129   : > { %694 = vmatpush.bf16.msra.mxu1 %v1097_v7  ;;  %v1094_v17 = vld [vmem:[%s1465_s22 + $0x60] sm:$0xff]  ;;  %v1093_v20 = vld [vmem:[%s1465_s22 + $0x58] sm:$0xff]  ;;  %v1092_v23 = vld [vmem:[%s1465_s22 + $0x50] sm:$0xff] }
 0x12a   : > { %572 = vmatpush.bf16.msra.mxu0 %v1088_v51  ;;  %v1091_v26 = vld [vmem:[%s1465_s22 + $0x48] sm:$0xff]  ;;  %v1090_v28 = vld [vmem:[%s1465_s22 + $0x40] sm:$0xff]  ;;  %v521_v34 = vld [vmem:[%s1479_s10] sm:$0x3] }
 0x12b   : > { %v621_v39 = vperm.slane %v521_v34, 1 }
 0x12c   : > { %v1175_v60 = vpop.eup %1174 }
 0x12d   : > { %v591_v61 = vmul.f32 8.0, %v1175_v60  ;;  %vm595_vm4 = vweird.f32 %v1175_v60  ;;  %695 = vmatpush.bf16.msra.mxu1 %v1096_v11 }
 0x12e   : > { %573 = vmatpush.bf16.msra.mxu0 %v1087_v52 }
 0x12f   : > { %v592_v62 = vsub.f32 1.0, %v591_v61 }
 0x131   : > { %v593_v1 = vmul.f32 %v1175_v60, %v592_v62  ;;  %696 = vmatpush.bf16.msra.mxu1 %v1095_v14 }
 0x132   : > { %574 = vmatpush.bf16.msra.mxu0 %v1086_v53 }
 0x133   : > { %v594_v4 = vadd.f32 %v1175_v60, %v593_v1 }
 0x135   : > { %v1499_v9 = vsel %vm595_vm4, %v1175_v60, %v594_v4  ;;  %697 = vmatpush.bf16.msra.mxu1 %v1094_v17 }
 0x136   : > { %575 = vmatpush.bf16.msra.mxu0 %v1085_v54 }
 0x139   : > { %698 = vmatpush.bf16.msra.mxu1 %v1093_v20 }
 0x13a   : > { %576 = vmatpush.bf16.msra.mxu0 %v1084_v55 }
 0x13d   : > { %699 = vmatpush.bf16.msra.mxu1 %v1092_v23 }
 0x13e   : > { %577 = vmatpush.bf16.msra.mxu0 %v1083_v56 }
 0x141   : > { %700 = vmatpush.bf16.msra.mxu1 %v1091_v26 }
 0x142   : > { %578 = vmatpush.bf16.msra.mxu0 %v1082_v57 }
 0x145   : > { %579 = vmatmul.bf16.vlgmr.msra.gmra.mxu0 %v522_v58  ;;  %701 = vmatpush.bf16.msra.mxu1 %v1090_v28 }
 0x1c2   : > { %v580_v63 = vpop.f32.mrf.mxu0 }
 0x1c3   : > { %v584_v0 = vrot.slane %v580_v63, 4 }
 0x1c5   : > { %v585_v2 = vadd.f32 %v584_v0, %v580_v63 }
 0x1c7   : > { %v586_v3 = vrot.slane %v585_v2, 2 }
 0x1c9   : > { %v587_v5 = vadd.f32 %v586_v3, %v585_v2 }
 0x1ca   : > { %v582_v6 = vpop.f32.mrf.mxu0 }
 0x1cb   : > { %v588_v8 = vrot.slane %v587_v5, 1 }
 0x1cd   : > { %v589_v10 = vadd.f32 %v588_v8, %v587_v5  ;;  %v1004_v5 = vld [vmem:[%s1479_s10 + $0x2] sm:$0x3] }
 0x1ce   : > { %v737_v11 = vperm.slane %v1004_v5, 1 }
 0x1cf   : > { %v597_v12 = vmul.f32 %v1499_v9, %v589_v10 }
 0x1d1   : > { %v598_v13 = vsub.f32 %v580_v63, %v597_v12 }
 0x1d3   : > { %v599_v15 = vmul.f32 %v598_v13, %v598_v13 }
 0x1d5   : > { %v600_v16 = vrot.slane %v599_v15, 4 }
 0x1d7   : > { %v601_v18 = vadd.f32 %v600_v16, %v599_v15 }
 0x1d9   : > { %v602_v19 = vrot.slane %v601_v18, 2 }
 0x1db   : > { %v603_v21 = vadd.f32 %v602_v19, %v601_v18 }
 0x1dd   : > { %v604_v22 = vrot.slane %v603_v21, 1 }
 0x1df   : > { %v605_v24 = vadd.f32 %v604_v22, %v603_v21 }
 0x1e1   : > { %v606_v25 = vmul.f32 %v605_v24, %v1499_v9 }
 0x1e3   : > { %v607_v27 = vadd.f32 1e-05, %v606_v25 }
 0x1e5   : > { %1176 = vrsqrt.f32 %v607_v27  ;;  %vm614_vm6 = vweird.f32 %v607_v27 }
 0x1eb   : > { %v1177_v29 = vpop.eup %1176 }
 0x1ec   : > { %v609_v30 = vmul.f32 %v1177_v29, %v607_v27  ;;  %vm615_vm5 = vweird.f32 %v1177_v29 }
 0x1ed   : > { %vm616_vm7 = vmor %vm614_vm6, %vm615_vm5 }
 0x1ee   : > { %v610_v31 = vmul.f32 %v1177_v29, %v609_v30 }
 0x1f0   : > { %v611_v32 = vmul.f32 0.5, %v610_v31 }
 0x1f2   : > { %v612_v33 = vsub.f32 1.5, %v611_v32 }
 0x1f4   : > { %v613_v35 = vmul.f32 %v1177_v29, %v612_v33 }
 0x1f6   : > { %v617_v36 = vsel %vm616_vm7, %v1177_v29, %v613_v35 }
 0x1f7   : > { %v618_v37 = vmul.f32 %v617_v36, %v521_v34 }
 0x1f9   : > { %v619_v38 = vperm.slane %v618_v37, 0 }
 0x1fb   : > { %v620_v40 = vmul.f32 %v619_v38, %v598_v13 }
 0x1fd   : > { %v622_v41 = vadd.f32 %v621_v39, %v620_v40 }
 0x1ff   : > { %v623_v42 = vmax.f32 %v622_v41, 0.0 }
 0x201   : > { %v624_v43 = vpack.c.bf16 %v623_v42, %v623_v42 }
 0x203   : > { %625 = vst [vmem:[#allocation2] sm:$0xf] %v624_v43 }
 0x20a   : > { %v645_v44 = vld [vmem:[#allocation2] sm:$0xf] }
 0x20b   : > { %702 = vmatmul.bf16.vlgmr.msra.gmra.mxu1 %v645_v44 }
 0x288   : > { %v703_v45 = vpop.f32.mrf.mxu1 }
 0x289   : > { %v707_v46 = vrot.slane %v703_v45, 4 }
 0x28b   : > { %v708_v47 = vadd.f32 %v707_v46, %v703_v45 }
 0x28d   : > { %v709_v48 = vrot.slane %v708_v47, 2 }
 0x28f   : > { %v710_v49 = vadd.f32 %v709_v48, %v708_v47 }
 0x290   : > { %v705_v50 = vpop.f32.mrf.mxu1 }
 0x291   : > { %v711_v51 = vrot.slane %v710_v49, 1 }
 0x293   : > { %v712_v52 = vadd.f32 %v711_v51, %v710_v49 }
 0x295   : > { %v713_v53 = vmul.f32 %v712_v52, %v1499_v9 }
 0x297   : > { %v714_v54 = vsub.f32 %v703_v45, %v713_v53 }
 0x299   : > { %v715_v55 = vmul.f32 %v714_v54, %v714_v54 }
 0x29b   : > { %v716_v56 = vrot.slane %v715_v55, 4 }
 0x29d   : > { %v717_v57 = vadd.f32 %v716_v56, %v715_v55 }
 0x29f   : > { %v718_v58 = vrot.slane %v717_v57, 2 }
 0x2a1   : > { %v719_v59 = vadd.f32 %v718_v58, %v717_v57 }
 0x2a3   : > { %v720_v60 = vrot.slane %v719_v59, 1 }
 0x2a5   : > { %v721_v61 = vadd.f32 %v720_v60, %v719_v59 }
 0x2a7   : > { %v722_v62 = vmul.f32 %v721_v61, %v1499_v9 }
 0x2a9   : > { %v723_v63 = vadd.f32 1e-05, %v722_v62 }
 0x2ab   : > { %1178 = vrsqrt.f32 %v723_v63  ;;  %vm730_vm9 = vweird.f32 %v723_v63 }
 0x2b1   : > { %v1179_v0 = vpop.eup %1178 }
 0x2b2   : > { %v725_v1 = vmul.f32 %v1179_v0, %v723_v63  ;;  %vm731_vm8 = vweird.f32 %v1179_v0 }
 0x2b3   : > { %vm732_vm10 = vmor %vm730_vm9, %vm731_vm8 }
 0x2b4   : > { %v726_v2 = vmul.f32 %v1179_v0, %v725_v1 }
 0x2b6   : > { %v727_v3 = vmul.f32 0.5, %v726_v2 }
 0x2b8   : > { %v728_v4 = vsub.f32 1.5, %v727_v3 }
 0x2ba   : > { %v729_v6 = vmul.f32 %v1179_v0, %v728_v4 }
 0x2bc   : > { %v733_v7 = vsel %vm732_vm10, %v1179_v0, %v729_v6 }
 0x2bd   : > { %v734_v8 = vmul.f32 %v1004_v5, %v733_v7 }
 0x2bf   : > { %v735_v10 = vperm.slane %v734_v8, 0 }
 0x2c1   : > { %v736_v12 = vmul.f32 %v735_v10, %v714_v54 }
 0x2c3   : > { %v738_v13 = vadd.f32 %v737_v11, %v736_v12 }
 0x2c5   : > { %v739_v14 = vmax.f32 %v738_v13, 0.0 }
 0x2c7   : > { %v740_v9 = vpack.c.bf16 %v739_v14, %v739_v14 }
 0x2c9   : > { %741 = vst [vmem:[#allocation2] sm:$0xf] %v740_v9 }
 0x2ca PF: > { %p1037_p4 = scmp.ne.s32.totalorder %s1380_s28, 1 }
 0x2cc   : > { %745 = sbr.rel (%p1037_p4) target bundleno = 887 (0x377), region = 72 }
 0x2d1   : > { %v1105_v15 = vld [vmem:[#allocation7 + $0x38] sm:$0xff]  ;;  %v1104_v16 = vld [vmem:[#allocation7 + $0x30] sm:$0xff]  ;;  %v1103_v17 = vld [vmem:[#allocation7 + $0x28] sm:$0xff] }
 0x2d2   : > { %815 = vmatpush.bf16.msra.mxu0 %v1105_v15  ;;  %v1102_v18 = vld [vmem:[#allocation7 + $0x20] sm:$0xff]  ;;  %v1101_v19 = vld [vmem:[#allocation7 + $0x18] sm:$0xff]  ;;  %v1100_v20 = vld [vmem:[#allocation7 + $0x10] sm:$0xff] }
 0x2d3   : > { %v1099_v21 = vld [vmem:[#allocation7 + $0x8] sm:$0xff]  ;;  %v1098_v22 = vld [vmem:[#allocation7] sm:$0xff]  ;;  %v746_v23 = vld [vmem:[#allocation2] sm:$0xf] }
 0x2d4   : > { %v1180_v24 = vld [vmem:[%s1540_s6] ss:$0 sm:$0xff] }
 0x2d6   : > { %816 = vmatpush.bf16.msra.mxu0 %v1104_v16 }
 0x2da   : > { %817 = vmatpush.bf16.msra.mxu0 %v1103_v17 }
 0x2de   : > { %818 = vmatpush.bf16.msra.mxu0 %v1102_v18 }
 0x2e2   : > { %819 = vmatpush.bf16.msra.mxu0 %v1101_v19 }
 0x2e6   : > { %820 = vmatpush.bf16.msra.mxu0 %v1100_v20 }
 0x2ea   : > { %821 = vmatpush.bf16.msra.mxu0 %v1099_v21 }
 0x2ee   : > { %822 = vmatpush.bf16.msra.mxu0 %v1098_v22 }
 0x2f1   : > { %823 = vmatmul.bf16.vlgmr.msra.gmra.mxu0 %v746_v23 }
 0x36e   : > { %v824_v25 = vpop.f32.mrf.mxu0 }
 0x36f   : > { %v825_v26 = vadd.f32 %v1180_v24, %v824_v25 }
 0x371   : > { %828 = vst [vmem:[%s1541_s7] sm:$0xff] %v825_v26 }
 0x376   : > { %v826_v27 = vpop.f32.mrf.mxu0 }
 0x377 PF: > { %p18_p5 = scmp.ge.s32.totalorder %s1414_s20, 4   ;;  %s1550_s24 = smov %s1305_s25 }
 0x378   : > { %s1551_s25 = smov %s1309_s26  ;;  %s1552_s26 = smov %s1431_s13 }
 0x379   : > { %s1553_s27 = smov %s1414_s20  ;;  %20 = sbr.rel (!%p18_p5) target bundleno = 4 (0x4), region = 110 }
 0x37e   :  { %840 = vsyncpa [#allocation4], 1 }
 0x37f   :  { %842 = vsyncpa [#allocation4 + $0x1], 1 }
 0x380   :  { %843 = vsyncpa [#allocation6], 1 }
 0x381   :  { %845 = vsyncpa [#allocation6 + $0x1], 1 }

</bundles_post_ra>
